<compile_context>
chip_gen: v7x
topology: tpu7x:2x2x1
jax: 0.10.0
libtpu: 0.0.40
codegen_flags: <defaults>
</compile_context>

<pallas_src>
import jax
import jax.numpy as jnp
from jax.experimental import pallas as pl
from jax.experimental.pallas import tpu as pltpu

LANES = 128  # batch rows folded into the lane dimension per super-row


def _round_up(n: int, m: int) -> int:
    return ((n + m - 1) // m) * m


def linear_kernel(x_ref, w_ref, b_ref, o_ref):
    # x_ref: (TBR, LANES*K) f32 VMEM block -- LANES batch rows folded per super-row
    # w_ref: (LANES*K, LANES) f32 VMEM block-diagonal replicated weight (constant
    #        block index -> copied into VMEM once)
    # b_ref: (1,) f32 SMEM scalar bias
    # o_ref: (TBR, LANES) f32 lane-dense output block
    y = jnp.dot(x_ref[...], w_ref[...], preferred_element_type=jnp.float32)
    o_ref[...] = (y + b_ref[0]).astype(o_ref.dtype)


def linear_regression_forward(features, weight, bias, *, block_super_rows: int = 512):
    """features: (B, 10) f32; weight: (1, 10) f32; bias: (1,) f32 -> (B, 1) f32."""
    B, K = features.shape
    out_f, in_f = weight.shape
    assert out_f == 1 and in_f == K and bias.shape == (1,)

    x = features.astype(jnp.float32)
    w = weight.astype(jnp.float32)
    b = bias.astype(jnp.float32)

    # Small alignment pad only (<= 127 rows); when B % 128 == 0 the reshape below
    # is a free bitcast of the contiguous row-major buffer.
    b_pad = _round_up(B, LANES)
    if b_pad != B:
        x = jnp.pad(x, ((0, b_pad - B), (0, 0)))
    R = b_pad // LANES
    x_folded = x.reshape(R, LANES * K)  # lane-dense view: 128 rows per super-row

    # Block-diagonal replicated weight: w_bd[l*K + k, l] = w[0, k]  (640 KiB f32).
    eye = jnp.eye(LANES, dtype=jnp.float32)
    w_bd = (eye[:, None, :] * w[0][None, :, None]).reshape(LANES * K, LANES)

    # Super-row tile: multiple of 8 sublanes (or the whole dim).  Default 512
    # super-rows -> ~2.5 MiB useful input per grid step; capped so the grid keeps
    # >= ~8 steps when there is enough work (pipelining + v7x megacore).
    if R <= 8:
        tbr = R
    else:
        tbr = min(block_super_rows, _round_up(pl.cdiv(R, 8), 8))
    grid = (pl.cdiv(R, tbr),)  # ragged last block: Pallas clips the output writes

    out = pl.pallas_call(
        linear_kernel,
        out_shape=jax.ShapeDtypeStruct((R, LANES), jnp.float32),
        grid_spec=pltpu.PrefetchScalarGridSpec(
            num_scalar_prefetch=0,
            grid=grid,
            in_specs=[
                # Streamed, double-buffered lane-dense feature tiles.
                pl.BlockSpec((tbr, LANES * K), lambda i: (i, 0)),
                # Replicated weight: constant block index -> fetched once.
                pl.BlockSpec((LANES * K, LANES), lambda i: (0, 0)),
                # Bias: scalar in SMEM.
                pl.BlockSpec(memory_space=pltpu.MemorySpace.SMEM),
            ],
            out_specs=pl.BlockSpec((tbr, LANES), lambda i: (i, 0)),
        ),
        compiler_params=pltpu.CompilerParams(
            # Super-row tiles are independent: shard across v7x's 2 TensorCores.
            dimension_semantics=("parallel",),
            vmem_limit_bytes=32 * 1024 * 1024,
        ),
    )(x_folded, w_bd, b)

    # (R, 128) row-major is exactly y in batch order -> back to the module's (B, 1).
    return out.reshape(b_pad, 1)[:B]


if __name__ == "__main__":
    key = jax.random.PRNGKey(0)
    k_x, k_w, k_b, k_x2, k_x3 = jax.random.split(key, 5)

    IN, OUT = 10, 1

    # Same shapes / init scale as torch.nn.Linear(10, 1): uniform(-1/sqrt(10), 1/sqrt(10)).
    bound = 1.0 / jnp.sqrt(jnp.float32(IN))
    weight = jax.random.uniform(k_w, (OUT, IN), jnp.float32, -bound, bound)
    bias = jax.random.uniform(k_b, (OUT,), jnp.float32, -bound, bound)

    # Case 1: tiny demo batch (pads to one 128-row lane fold, single grid step).
    x_small = jax.random.normal(k_x, (8, IN), jnp.float32)
    y_small = jax.block_until_ready(linear_regression_forward(x_small, weight, bias))

    # Case 2: non-multiple-of-128 batch (alignment pad path, single block).
    x_mid = jax.random.normal(k_x2, (200, IN), jnp.float32)
    y_mid = jax.block_until_ready(linear_regression_forward(x_mid, weight, bias))

    # Case 3: multi-step pipelined grid + ragged last super-row block
    # (B=1300 -> 11 super-rows, TBR=8, grid=2, last block partially out of bounds).
    x_big = jax.random.normal(k_x3, (1300, IN), jnp.float32)
    y_big = jax.block_until_ready(linear_regression_forward(x_big, weight, bias))

    for x, y in ((x_small, y_small), (x_mid, y_mid), (x_big, y_big)):
        ref = x @ weight.T + bias
        assert y.shape == ref.shape
        err = float(jnp.max(jnp.abs(y - ref)))
        assert jnp.allclose(y, ref, atol=1e-5, rtol=1e-5), err

    print("KERNEL_OK")
</pallas_src>

<mosaic_0001>
module attributes {stable_mosaic.version = 11 : i64} {
  func.func @linear_kernel(%arg0: i32, %arg1: memref<1x1280xf32, #tpu.memory_space<vmem>>, %arg2: memref<1280x128xf32, #tpu.memory_space<vmem>>, %arg3: memref<1xf32, #tpu.memory_space<smem>>, %arg4: memref<1x128xf32, #tpu.memory_space<vmem>>) attributes {dimension_semantics = [#tpu.dimension_semantics<parallel>], iteration_bounds = array<i64: 1>, scalar_prefetch = 0 : i64, scratch_operands = 0 : i64, tpu.core_type = #tpu.core_type<tc>, window_params = [{transform_indices = @transform_0, window_bounds = array<i64: 1, 1280>}, {pipeline_mode = #tpu.pipeline_mode<synchronous>, transform_indices = @transform_1, window_bounds = array<i64: 1280, 128>}, {transform_indices = @transform_2, window_bounds = array<i64: 1>}, {transform_indices = @transform_3, window_bounds = array<i64: 1, 128>}]} {
    %c0 = arith.constant 0 : index
    %c0_0 = arith.constant 0 : index
    %0 = vector.load %arg1[%c0, %c0_0] : memref<1x1280xf32, #tpu.memory_space<vmem>>, vector<1x1280xf32>
    %c0_1 = arith.constant 0 : index
    %c0_2 = arith.constant 0 : index
    %1 = vector.load %arg2[%c0_1, %c0_2] : memref<1280x128xf32, #tpu.memory_space<vmem>>, vector<1280x128xf32>
    %cst = arith.constant dense<0.000000e+00> : vector<1x128xf32>
    %2 = tpu.matmul %0, %1, %cst {dimension_numbers = #tpu.dot_dimension_numbers<[1], [0], [0], [1], [0, 0, 1, 1], [], []>} : vector<1x1280xf32>, vector<1280x128xf32>, vector<1x128xf32> -> vector<1x128xf32>
    %c0_3 = arith.constant 0 : index
    %3 = memref.load %arg3[%c0_3] : memref<1xf32, #tpu.memory_space<smem>>
    %4 = vector.broadcast %3 : f32 to vector<1x128xf32>
    %5 = arith.addf %2, %4 : vector<1x128xf32>
    %c0_4 = arith.constant 0 : index
    %c0_5 = arith.constant 0 : index
    %6 = vector.load %arg4[%c0_4, %c0_5] : memref<1x128xf32, #tpu.memory_space<vmem>>, vector<1x128xf32>
    tpu.vector_store %arg4[%c0_4, %c0_5], %5 {strides = array<i32>} : memref<1x128xf32, #tpu.memory_space<vmem>>, vector<1x128xf32>,
    return
  }
  func.func @transform_0(%arg0: i32) -> (i32, i32) {
    %c0_i32 = arith.constant 0 : i32
    %c0_i32_0 = arith.constant 0 : i32
    return %arg0, %c0_i32 : i32, i32
  }
  func.func @transform_1(%arg0: i32) -> (i32, i32) {
    %c0_i32 = arith.constant 0 : i32
    %c0_i32_0 = arith.constant 0 : i32
    %c0_i32_1 = arith.constant 0 : i32
    return %c0_i32, %c0_i32_0 : i32, i32
  }
  func.func @transform_2(%arg0: i32) -> i32 {
    %c0_i32 = arith.constant 0 : i32
    %c0_i32_0 = arith.constant 0 : i32
    return %c0_i32 : i32
  }
  func.func @transform_3(%arg0: i32) -> (i32, i32) {
    %c0_i32 = arith.constant 0 : i32
    %c0_i32_0 = arith.constant 0 : i32
    return %arg0, %c0_i32 : i32, i32
  }
}

</mosaic_0001>

<bundles_post_ra>
// kernel: tpu_custom_call.1
= control target key start
LH: loop header
LB: loop body
LE: loop exit
PB: predicated region body
PF: predicated region fallthrough
CT: control target
= control target key end

     0   :  { %9 = vsyncpa [#allocation4], 0  ;;  %s1140_s0 = inlined_call_operand.hbm [shape: f32[1,1280], index: 0, kind: input, shape index: {}]   ;;  %s1141_s1 = inlined_call_operand.hbm [shape: f32[1280,128], index: 1, kind: input, shape index: {}]   ;;  %s1142_s2 = inlined_call_operand.<no memory space> [shape: f32[1], index: 2, kind: input, shape index: {}]   ;;  %s1143_s3 = inlined_call_operand.hbm [shape: f32[1,128], index: 3, kind: output, shape index: {}]  }
   0x1   :  { %10 = vsyncpa [#allocation7], 0 }
   0x2   :  { %11 = vsyncpa [#allocation5], 0  ;;  %s1037_s12 = smov [#allocation3]   ;;  %s1038_s14 = smov [#allocation6]  }
   0x3   :  { %s18_s13 = sshll.u32 %s1037_s12, 4  ;;  %s27_s15 = sshll.u32 %s1038_s14, 4  ;;  %s19_s13 = int_to_ptr.vmem [resolvable:$true] %s18_s13  ;;  %s1062_s15 = int_to_ptr.vmem [resolvable:$true] %s27_s15 }
   0x4   :  { %s965_s18 = scalar_lea.hbm %s1140_s0, 160 }
   0x5   :  { %p966_p0 = scmp.ne.s32.totalorder %s1140_s0, %s965_s18  ;;  %p969_p1 = scmp.lt.u32.totalorder %s965_s18, %s1140_s0 }
   0x7   :  { %p971_p2 = pnand %p969_p1, %p966_p0 }
   0x9   :  { %974 = shalt.err (!%p971_p2)
}
   0xa   :  { %s975_s23 = scalar_lea.vmem %s19_s13, 160  ;;  %p980_p4 = scmp.lt.s32.totalorder %s19_s13, %s19_s13 }
   0xb   :  { %p976_p3 = scmp.ne.s32.totalorder %s19_s13, %s975_s23  ;;  %p981_p5 = scmp.lt.s32.totalorder %s975_s23, %s975_s23 }
   0xd   :  { %p982_p6 = por %p981_p5, %p980_p4 }
   0xf   :  { %p983_p7 = pnand %p982_p6, %p976_p3 }
  0x11   :  { %986 = shalt.err (!%p983_p7)
}
  0x12   :  { %21 = dma.hbm_to_vmem [thread:$0]  %s1140_s0, 160, %s19_s13, [#allocation4]  }
  0x13   :  { %s987_s28 = scalar_lea.hbm %s1141_s1, 20480 }
  0x14   :  { %p988_p8 = scmp.ne.s32.totalorder %s1141_s1, %s987_s28  ;;  %p991_p9 = scmp.lt.u32.totalorder %s987_s28, %s1141_s1 }
  0x16   :  { %p993_p10 = pnand %p991_p9, %p988_p8 }
  0x18   :  { %996 = shalt.err (!%p993_p10)
}
  0x19   :  { %s997_s6 = scalar_lea.vmem %s1062_s15, 20480  ;;  %p1002_p12 = scmp.lt.s32.totalorder %s1062_s15, %s1062_s15 }
  0x1a   :  { %p998_p11 = scmp.ne.s32.totalorder %s1062_s15, %s997_s6  ;;  %p1003_p13 = scmp.lt.s32.totalorder %s997_s6, %s997_s6 }
  0x1c   :  { %p1004_p0 = por %p1003_p13, %p1002_p12 }
  0x1e   :  { %p1005_p1 = pnand %p1004_p0, %p998_p11 }
  0x20   :  { %1008 = shalt.err (!%p1005_p1)
}
  0x21   :  { %s1039_s0 = smov 128   ;;  %s1040_s7 = smov 8  }
  0x22   :  { %33 = dma.hbm_to_vmem [thread:$0]  %s1141_s1, 20480, %s1062_s15, [#allocation7], %s1039_s0, %s1039_s0, %s1040_s7  }
  0x23   :  { %1031 = dma.done.wait [#allocation4], 160  }
  0x24   :  { %1032 = vsyncadd [#allocation4], 4294967136 }
  0x25   :  { %1033 = dma.done.wait [#allocation7], 20480  }
  0x26   :  { %1034 = vsyncadd [#allocation7], 4294946816  ;;  %v60_v0 = vld [vmem:[#allocation6 + $0x80] sm:$0xff]  ;;  %v61_v1 = vld [vmem:[#allocation6 + $0x88] sm:$0xff]  ;;  %v208_v43 = vlaneseq  ;;  %s1041_s11 = smov [#allocation8]  }
  0x27   :  { %v44_v2 = vld [vmem:[#allocation6] sm:$0xff]  ;;  %v800_v3 = vpack.c.bf16 %v61_v1, %v60_v0  ;;  %v45_v4 = vld [vmem:[#allocation6 + $0x8] sm:$0xff]  ;;  %v62_v11 = vld [vmem:[#allocation6 + $0x90] sm:$0xff]  ;;  %s615_s12 = sshll.u32 %s1041_s11, 4  ;;  %s616_s12 = int_to_ptr.vmem [resolvable:$true] %s615_s12 }
  0x28   :  { %v92_v5 = vld [vmem:[#allocation6 + $0x180] sm:$0xff]  ;;  %v93_v6 = vld [vmem:[#allocation6 + $0x188] sm:$0xff]  ;;  %v802_v7 = vpack.c.bf16 %v45_v4, %v44_v2  ;;  %v63_v13 = vld [vmem:[#allocation6 + $0x98] sm:$0xff]  ;;  %v1093_v57 = vshrl.u32 %v208_v43, 7  ;;  %s1013_s13 = scalar_lea.vmem %s616_s12, 32  ;;  %p1014_p3 = scmp.lt.s32.totalorder %s616_s12, %s616_s12 }
  0x29   :  { %v832_v8 = vpack.c.bf16 %v93_v6, %v92_v5  ;;  %v76_v9 = vld [vmem:[#allocation6 + $0x100] sm:$0xff]  ;;  %v77_v10 = vld [vmem:[#allocation6 + $0x108] sm:$0xff]  ;;  %801 = vmatprep.subr.bf16.mxu0 %v800_v3  ;;  %v46_v14 = vld [vmem:[#allocation6 + $0x10] sm:$0xff]  ;;  %v804_v16 = vpack.c.bf16 %v63_v13, %v62_v11 }
  0x2a   :  { %v834_v12 = vpack.c.bf16 %v77_v10, %v76_v9  ;;  %v47_v15 = vld [vmem:[#allocation6 + $0x18] sm:$0xff]  ;;  %803 = vmatpush3.bf16.msra.mxu0 %v802_v7  ;;  %v94_v18 = vld [vmem:[#allocation6 + $0x190] sm:$0xff]  ;;  %v64_v23 = vld [vmem:[#allocation6 + $0xa0] sm:$0xff]  ;;  %v214_v6 = vsub.s32 1, %v1093_v57  ;;  %v222_v11 = vsub.s32 3, %v1093_v57  ;;  %v218_v43 = vsub.s32 2, %v1093_v57 }
  0x2b   :  { %833 = vmatprep.subr.bf16.mxu1 %v832_v8  ;;  %v806_v17 = vpack.c.bf16 %v47_v15, %v46_v14  ;;  %v95_v19 = vld [vmem:[#allocation6 + $0x198] sm:$0xff]  ;;  %v78_v20 = vld [vmem:[#allocation6 + $0x110] sm:$0xff]  ;;  %v65_v24 = vld [vmem:[#allocation6 + $0xa8] sm:$0xff]  ;;  %805 = vmatprep.subr.bf16.mxu0 %v804_v16 }
  0x2c   :  { %835 = vmatpush3.bf16.msra.mxu1 %v834_v12  ;;  %v836_v21 = vpack.c.bf16 %v95_v19, %v94_v18  ;;  %v79_v22 = vld [vmem:[#allocation6 + $0x118] sm:$0xff]  ;;  %v808_v26 = vpack.c.bf16 %v65_v24, %v64_v23  ;;  %v48_v27 = vld [vmem:[#allocation6 + $0x20] sm:$0xff]  ;;  %v49_v28 = vld [vmem:[#allocation6 + $0x28] sm:$0xff] }
  0x2d   :  { %v838_v25 = vpack.c.bf16 %v79_v22, %v78_v20  ;;  %v96_v29 = vld [vmem:[#allocation6 + $0x1a0] sm:$0xff]  ;;  %v97_v30 = vld [vmem:[#allocation6 + $0x1a8] sm:$0xff]  ;;  %v810_v33 = vpack.c.bf16 %v49_v28, %v48_v27  ;;  %v66_v35 = vld [vmem:[#allocation6 + $0xb0] sm:$0xff] }
  0x2e   :  { %837 = vmatprep.subr.bf16.mxu1 %v836_v21  ;;  %v80_v31 = vld [vmem:[#allocation6 + $0x120] sm:$0xff]  ;;  %v81_v32 = vld [vmem:[#allocation6 + $0x128] sm:$0xff]  ;;  %807 = vmatpush3.bf16.msra.mxu0 %v806_v17  ;;  %v840_v34 = vpack.c.bf16 %v97_v30, %v96_v29  ;;  %v67_v36 = vld [vmem:[#allocation6 + $0xb8] sm:$0xff] }
  0x2f   :  { %v50_v37 = vld [vmem:[#allocation6 + $0x30] sm:$0xff]  ;;  %809 = vmatprep.subr.bf16.mxu0 %v808_v26  ;;  %v842_v38 = vpack.c.bf16 %v81_v32, %v80_v31  ;;  %v812_v39 = vpack.c.bf16 %v67_v36, %v66_v35  ;;  %v51_v40 = vld [vmem:[#allocation6 + $0x38] sm:$0xff]  ;;  %v68_v47 = vld [vmem:[#allocation6 + $0xc0] sm:$0xff] }
  0x30   :  { %839 = vmatpush3.bf16.msra.mxu1 %v838_v25  ;;  %v98_v41 = vld [vmem:[#allocation6 + $0x1b0] sm:$0xff]  ;;  %v99_v42 = vld [vmem:[#allocation6 + $0x1b8] sm:$0xff]  ;;  %v69_v48 = vld [vmem:[#allocation6 + $0xc8] sm:$0xff]  ;;  %v814_v49 = vpack.c.bf16 %v51_v40, %v50_v37 }
  0x31   :  { %841 = vmatprep.subr.bf16.mxu1 %v840_v34  ;;  %v844_v44 = vpack.c.bf16 %v99_v42, %v98_v41  ;;  %v82_v45 = vld [vmem:[#allocation6 + $0x130] sm:$0xff]  ;;  %v83_v46 = vld [vmem:[#allocation6 + $0x138] sm:$0xff]  ;;  %v100_v50 = vld [vmem:[#allocation6 + $0x1c0] sm:$0xff]  ;;  %v816_v53 = vpack.c.bf16 %v69_v48, %v68_v47 }
  0x32   :  { %811 = vmatpush3.bf16.msra.mxu0 %v810_v33  ;;  %v101_v51 = vld [vmem:[#allocation6 + $0x1c8] sm:$0xff]  ;;  %v846_v52 = vpack.c.bf16 %v83_v46, %v82_v45  ;;  %v52_v54 = vld [vmem:[#allocation6 + $0x40] sm:$0xff]  ;;  %v70_v60 = vld [vmem:[#allocation6 + $0xd0] sm:$0xff] }
  0x33   :  { %813 = vmatprep.subr.bf16.mxu0 %v812_v39  ;;  %v53_v55 = vld [vmem:[#allocation6 + $0x48] sm:$0xff]  ;;  %v84_v56 = vld [vmem:[#allocation6 + $0x140] sm:$0xff]  ;;  %v848_v58 = vpack.c.bf16 %v101_v51, %v100_v50  ;;  %v71_v61 = vld [vmem:[#allocation6 + $0xd8] sm:$0xff]  ;;  %v210_v39 = vsub.s32 0, %v1093_v57 }
  0x34   :  { %843 = vmatpush3.bf16.msra.mxu1 %v842_v38  ;;  %v85_v59 = vld [vmem:[#allocation6 + $0x148] sm:$0xff]  ;;  %v102_v62 = vld [vmem:[#allocation6 + $0x1d0] sm:$0xff]  ;;  %v103_v63 = vld [vmem:[#allocation6 + $0x1d8] sm:$0xff]  ;;  %v818_v0 = vpack.c.bf16 %v53_v55, %v52_v54  ;;  %v820_v2 = vpack.c.bf16 %v71_v61, %v70_v60 }
  0x35   :  { %845 = vmatprep.subr.bf16.mxu1 %v844_v44  ;;  %v850_v1 = vpack.c.bf16 %v85_v59, %v84_v56  ;;  %v54_v3 = vld [vmem:[#allocation6 + $0x50] sm:$0xff]  ;;  %v55_v4 = vld [vmem:[#allocation6 + $0x58] sm:$0xff]  ;;  %v852_v7 = vpack.c.bf16 %v103_v63, %v102_v62  ;;  %v72_v9 = vld [vmem:[#allocation6 + $0xe0] sm:$0xff] }
  0x36   :  { %815 = vmatpush3.bf16.msra.mxu0 %v814_v49  ;;  %v86_v5 = vld [vmem:[#allocation6 + $0x150] sm:$0xff]  ;;  %v87_v8 = vld [vmem:[#allocation6 + $0x158] sm:$0xff]  ;;  %v73_v10 = vld [vmem:[#allocation6 + $0xe8] sm:$0xff]  ;;  %v822_v14 = vpack.c.bf16 %v55_v4, %v54_v3 }
  0x37   :  { %817 = vmatprep.subr.bf16.mxu0 %v816_v53  ;;  %v104_v12 = vld [vmem:[#allocation6 + $0x1e0] sm:$0xff]  ;;  %v105_v13 = vld [vmem:[#allocation6 + $0x1e8] sm:$0xff]  ;;  %v1097_v15 = vld [vmem:[#allocation3] sm:$0xff]  ;;  %v854_v16 = vpack.c.bf16 %v87_v8, %v86_v5  ;;  %v824_v17 = vpack.c.bf16 %v73_v10, %v72_v9  ;;  %v230_v53 = vsub.s32 5, %v1093_v57 }
  0x38   :  { %847 = vmatpush3.bf16.msra.mxu1 %v846_v52  ;;  %v56_v18 = vld [vmem:[#allocation6 + $0x60] sm:$0xff]  ;;  %v57_v19 = vld [vmem:[#allocation6 + $0x68] sm:$0xff]  ;;  %v215_v21 = vrot.slane %v1097_v15, %v214_v6  ;;  %v856_v22 = vpack.c.bf16 %v105_v13, %v104_v12  ;;  %v74_v24 = vld [vmem:[#allocation6 + $0xf0] sm:$0xff]  ;;  %v223_v26 = vrot.slane %v1097_v15, %v222_v11  ;;  %v211_v54 = vrot.slane %v1097_v15, %v210_v39 }
  0x39   :  { %849 = vmatprep.subr.bf16.mxu1 %v848_v58  ;;  %v88_v20 = vld [vmem:[#allocation6 + $0x160] sm:$0xff]  ;;  %v89_v23 = vld [vmem:[#allocation6 + $0x168] sm:$0xff]  ;;  %v75_v25 = vld [vmem:[#allocation6 + $0xf8] sm:$0xff]  ;;  %v826_v29 = vpack.c.bf16 %v57_v19, %v56_v18  ;;  %v238_v58 = vsub.s32 7, %v1093_v57  ;;  %v219_v60 = vrot.slane %v1097_v15, %v218_v43 }
  0x3a   :  { %819 = vmatpush3.bf16.msra.mxu0 %v818_v0  ;;  %v106_v27 = vld [vmem:[#allocation6 + $0x1f0] sm:$0xff]  ;;  %v107_v28 = vld [vmem:[#allocation6 + $0x1f8] sm:$0xff]  ;;  %322 = vmatprep.mubr.f32.mxu0 %v215_v21  ;;  %v858_v30 = vpack.c.bf16 %v89_v23, %v88_v20  ;;  %v828_v31 = vpack.c.bf16 %v75_v25, %v74_v24  ;;  %v124_v37 = vld [vmem:[#allocation6 + $0x280] sm:$0xff] }
  0x3b   :  { %821 = vmatprep.subr.bf16.mxu0 %v820_v2  ;;  %392 = vmatprep.mubr.f32.mxu1 %v223_v26  ;;  %v58_v32 = vld [vmem:[#allocation6 + $0x70] sm:$0xff]  ;;  %v59_v33 = vld [vmem:[#allocation6 + $0x78] sm:$0xff]  ;;  %v860_v35 = vpack.c.bf16 %v107_v28, %v106_v27  ;;  %v125_v38 = vld [vmem:[#allocation6 + $0x288] sm:$0xff]  ;;  %v239_v10 = vrot.slane %v1097_v15, %v238_v58 }
  0x3c   :  { %851 = vmatpush3.bf16.msra.mxu1 %v850_v1  ;;  %v90_v34 = vld [vmem:[#allocation6 + $0x170] sm:$0xff]  ;;  %v91_v36 = vld [vmem:[#allocation6 + $0x178] sm:$0xff]  ;;  %v156_v40 = vld [vmem:[#allocation6 + $0x380] sm:$0xff]  ;;  %v830_v42 = vpack.c.bf16 %v59_v33, %v58_v32  ;;  %v864_v45 = vpack.c.bf16 %v125_v38, %v124_v37 }
  0x3d   :  { %853 = vmatprep.subr.bf16.mxu1 %v852_v7  ;;  %v157_v41 = vld [vmem:[#allocation6 + $0x388] sm:$0xff]  ;;  %v862_v44 = vpack.c.bf16 %v91_v36, %v90_v34  ;;  %v108_v46 = vld [vmem:[#allocation6 + $0x200] sm:$0xff]  ;;  %v126_v51 = vld [vmem:[#allocation6 + $0x290] sm:$0xff]  ;;  %v231_v7 = vrot.slane %v1097_v15, %v230_v53 }
  0x3e   :  { %823 = vmatpush3.bf16.msra.mxu0 %v822_v14  ;;  %v109_v47 = vld [vmem:[#allocation6 + $0x208] sm:$0xff]  ;;  %v140_v48 = vld [vmem:[#allocation6 + $0x300] sm:$0xff]  ;;  %v896_v49 = vpack.c.bf16 %v157_v41, %v156_v40  ;;  %v127_v52 = vld [vmem:[#allocation6 + $0x298] sm:$0xff] }
  0x3f   :  { %825 = vmatprep.subr.bf16.mxu0 %v824_v17  ;;  %v141_v50 = vld [vmem:[#allocation6 + $0x308] sm:$0xff]  ;;  %v158_v55 = vld [vmem:[#allocation6 + $0x390] sm:$0xff]  ;;  %v159_v56 = vld [vmem:[#allocation6 + $0x398] sm:$0xff]  ;;  %v866_v59 = vpack.c.bf16 %v109_v47, %v108_v46  ;;  %v868_v62 = vpack.c.bf16 %v127_v52, %v126_v51 }
  0x40   :  { %855 = vmatpush3.bf16.msra.mxu1 %v854_v16  ;;  %v898_v61 = vpack.c.bf16 %v141_v50, %v140_v48  ;;  %v110_v63 = vld [vmem:[#allocation6 + $0x210] sm:$0xff]  ;;  %v111_v0 = vld [vmem:[#allocation6 + $0x218] sm:$0xff]  ;;  %v900_v2 = vpack.c.bf16 %v159_v56, %v158_v55  ;;  %v128_v4 = vld [vmem:[#allocation6 + $0x2a0] sm:$0xff] }
  0x41   :  { %857 = vmatprep.subr.bf16.mxu1 %v856_v22  ;;  %v142_v1 = vld [vmem:[#allocation6 + $0x310] sm:$0xff]  ;;  %v143_v3 = vld [vmem:[#allocation6 + $0x318] sm:$0xff]  ;;  %v129_v5 = vld [vmem:[#allocation6 + $0x2a8] sm:$0xff]  ;;  %v870_v11 = vpack.c.bf16 %v111_v0, %v110_v63 }
  0x42   :  { %827 = vmatpush3.bf16.msra.mxu0 %v826_v29  ;;  %v160_v8 = vld [vmem:[#allocation6 + $0x3a0] sm:$0xff]  ;;  %v161_v9 = vld [vmem:[#allocation6 + $0x3a8] sm:$0xff]  ;;  %v902_v12 = vpack.c.bf16 %v143_v3, %v142_v1  ;;  %v872_v13 = vpack.c.bf16 %v129_v5, %v128_v4  ;;  %v130_v20 = vld [vmem:[#allocation6 + $0x2b0] sm:$0xff] }
  0x43   :  { %829 = vmatprep.subr.bf16.mxu0 %v828_v31  ;;  %v112_v14 = vld [vmem:[#allocation6 + $0x220] sm:$0xff]  ;;  %v113_v16 = vld [vmem:[#allocation6 + $0x228] sm:$0xff]  ;;  %v904_v18 = vpack.c.bf16 %v161_v9, %v160_v8  ;;  %v131_v21 = vld [vmem:[#allocation6 + $0x2b8] sm:$0xff] }
  0x44   :  { %859 = vmatpush3.bf16.msra.mxu1 %v858_v30  ;;  %v144_v17 = vld [vmem:[#allocation6 + $0x320] sm:$0xff]  ;;  %v145_v19 = vld [vmem:[#allocation6 + $0x328] sm:$0xff]  ;;  %v162_v22 = vld [vmem:[#allocation6 + $0x3b0] sm:$0xff]  ;;  %v874_v24 = vpack.c.bf16 %v113_v16, %v112_v14  ;;  %v876_v26 = vpack.c.bf16 %v131_v21, %v130_v20 }
  0x45   :  { %861 = vmatprep.subr.bf16.mxu1 %v860_v35  ;;  %v163_v23 = vld [vmem:[#allocation6 + $0x3b8] sm:$0xff]  ;;  %v906_v25 = vpack.c.bf16 %v145_v19, %v144_v17  ;;  %v114_v27 = vld [vmem:[#allocation6 + $0x230] sm:$0xff]  ;;  %v132_v32 = vld [vmem:[#allocation6 + $0x2c0] sm:$0xff] }
  0x46   :  { %831 = vmatpush3.bf16.msra.mxu0 %v830_v42  ;;  %v115_v28 = vld [vmem:[#allocation6 + $0x238] sm:$0xff]  ;;  %v146_v29 = vld [vmem:[#allocation6 + $0x330] sm:$0xff]  ;;  %v908_v30 = vpack.c.bf16 %v163_v23, %v162_v22  ;;  %v133_v33 = vld [vmem:[#allocation6 + $0x2c8] sm:$0xff]  ;;  %v226_v22 = vsub.s32 4, %v1093_v57 }
  0x47   :  { %865 = vmatprep.subr.bf16.mxu0 %v864_v45  ;;  %v147_v31 = vld [vmem:[#allocation6 + $0x338] sm:$0xff]  ;;  %v164_v34 = vld [vmem:[#allocation6 + $0x3c0] sm:$0xff]  ;;  %v165_v35 = vld [vmem:[#allocation6 + $0x3c8] sm:$0xff]  ;;  %v878_v36 = vpack.c.bf16 %v115_v28, %v114_v27  ;;  %v880_v38 = vpack.c.bf16 %v133_v33, %v132_v32 }
  0x48   :  { %863 = vmatpush3.bf16.msra.mxu1 %v862_v44  ;;  %v910_v37 = vpack.c.bf16 %v147_v31, %v146_v29  ;;  %v116_v40 = vld [vmem:[#allocation6 + $0x240] sm:$0xff]  ;;  %v117_v41 = vld [vmem:[#allocation6 + $0x248] sm:$0xff]  ;;  %v912_v43 = vpack.c.bf16 %v165_v35, %v164_v34  ;;  %v134_v45 = vld [vmem:[#allocation6 + $0x2d0] sm:$0xff]  ;;  %v227_v32 = vrot.slane %v1097_v15, %v226_v22 }
  0x49   :  { %897 = vmatprep.subr.bf16.mxu1 %v896_v49  ;;  %323 = vmatmul.mubr.f32.vlgmr.msra.gmra.mrb[0].mxu0 %v211_v54  ;;  %v148_v42 = vld [vmem:[#allocation6 + $0x340] sm:$0xff]  ;;  %v149_v44 = vld [vmem:[#allocation6 + $0x348] sm:$0xff]  ;;  %v135_v46 = vld [vmem:[#allocation6 + $0x2d8] sm:$0xff]  ;;  %v882_v49 = vpack.c.bf16 %v117_v41, %v116_v40 }
  0x4a   :  { %867 = vmatpush3.bf16.msra.mxu0 %v866_v59  ;;  %462 = vmatprep.mubr.f32.mxu0 %v231_v7  ;;  %v166_v47 = vld [vmem:[#allocation6 + $0x3d0] sm:$0xff]  ;;  %v167_v48 = vld [vmem:[#allocation6 + $0x3d8] sm:$0xff]  ;;  %v914_v50 = vpack.c.bf16 %v149_v44, %v148_v42  ;;  %v884_v51 = vpack.c.bf16 %v135_v46, %v134_v45  ;;  %v136_v58 = vld [vmem:[#allocation6 + $0x2e0] sm:$0xff] }
  0x4b   :  { %393 = vmatmul.mubr.f32.vlgmr.msra.gmra.mrb[0].mxu1 %v219_v60  ;;  %869 = vmatprep.subr.bf16.mxu0 %v868_v62  ;;  %v118_v52 = vld [vmem:[#allocation6 + $0x250] sm:$0xff]  ;;  %v119_v53 = vld [vmem:[#allocation6 + $0x258] sm:$0xff]  ;;  %v916_v55 = vpack.c.bf16 %v167_v48, %v166_v47  ;;  %v137_v59 = vld [vmem:[#allocation6 + $0x2e8] sm:$0xff] }
  0x4c   :  { %899 = vmatpush3.bf16.msra.mxu1 %v898_v61  ;;  %532 = vmatprep.mubr.f32.mxu1 %v239_v10  ;;  %v150_v54 = vld [vmem:[#allocation6 + $0x350] sm:$0xff]  ;;  %v151_v56 = vld [vmem:[#allocation6 + $0x358] sm:$0xff]  ;;  %v168_v60 = vld [vmem:[#allocation6 + $0x3e0] sm:$0xff]  ;;  %v886_v62 = vpack.c.bf16 %v119_v53, %v118_v52  ;;  %v888_v0 = vpack.c.bf16 %v137_v59, %v136_v58 }
  0x4d   :  { %901 = vmatprep.subr.bf16.mxu1 %v900_v2  ;;  %v169_v61 = vld [vmem:[#allocation6 + $0x3e8] sm:$0xff]  ;;  %v918_v63 = vpack.c.bf16 %v151_v56, %v150_v54  ;;  %v120_v1 = vld [vmem:[#allocation6 + $0x260] sm:$0xff]  ;;  %v138_v7 = vld [vmem:[#allocation6 + $0x2f0] sm:$0xff] }
  0x4e   :  { %871 = vmatpush3.bf16.msra.mxu0 %v870_v11  ;;  %v121_v2 = vld [vmem:[#allocation6 + $0x268] sm:$0xff]  ;;  %v152_v3 = vld [vmem:[#allocation6 + $0x360] sm:$0xff]  ;;  %v920_v4 = vpack.c.bf16 %v169_v61, %v168_v60  ;;  %v139_v8 = vld [vmem:[#allocation6 + $0x2f8] sm:$0xff] }
  0x4f   :  { %873 = vmatprep.subr.bf16.mxu0 %v872_v13  ;;  %v153_v5 = vld [vmem:[#allocation6 + $0x368] sm:$0xff]  ;;  %v170_v9 = vld [vmem:[#allocation6 + $0x3f0] sm:$0xff]  ;;  %v171_v10 = vld [vmem:[#allocation6 + $0x3f8] sm:$0xff]  ;;  %v890_v11 = vpack.c.bf16 %v121_v2, %v120_v1  ;;  %v892_v13 = vpack.c.bf16 %v139_v8, %v138_v7 }
  0x50   :  { %903 = vmatpush3.bf16.msra.mxu1 %v902_v12  ;;  %v922_v12 = vpack.c.bf16 %v153_v5, %v152_v3  ;;  %v122_v14 = vld [vmem:[#allocation6 + $0x270] sm:$0xff]  ;;  %v123_v16 = vld [vmem:[#allocation6 + $0x278] sm:$0xff]  ;;  %v188_v20 = vld [vmem:[#allocation6 + $0x480] sm:$0xff] }
  0x51   :  { %905 = vmatprep.subr.bf16.mxu1 %v904_v18  ;;  %v154_v17 = vld [vmem:[#allocation6 + $0x370] sm:$0xff]  ;;  %v924_v18 = vpack.c.bf16 %v171_v10, %v170_v9  ;;  %v155_v19 = vld [vmem:[#allocation6 + $0x378] sm:$0xff]  ;;  %v189_v21 = vld [vmem:[#allocation6 + $0x488] sm:$0xff]  ;;  %v894_v23 = vpack.c.bf16 %v123_v16, %v122_v14  ;;  %v205_v16 = vstv %s1142_s2  ;;  %s1009_s2 = scalar_lea.vmem %s616_s12, 16 }
  0x52   :  { %875 = vmatpush3.bf16.msra.mxu0 %v874_v24  ;;  %v234_v24 = vsub.s32 6, %v1093_v57  ;;  %v172_v27 = vld [vmem:[#allocation6 + $0x400] sm:$0xff]  ;;  %v173_v28 = vld [vmem:[#allocation6 + $0x408] sm:$0xff]  ;;  %v190_v29 = vld [vmem:[#allocation6 + $0x490] sm:$0xff]  ;;  %p1010_p2 = scmp.ne.s32.totalorder %s616_s12, %s1009_s2  ;;  %p1015_p4 = scmp.lt.s32.totalorder %s1013_s13, %s1009_s2 }
  0x53   :  { %877 = vmatprep.subr.bf16.mxu0 %v876_v26  ;;  %v928_v26 = vpack.c.bf16 %v189_v21, %v188_v20  ;;  %v1115_v31 = vld [vmem:[#allocation3 + $0x8] sm:$0x3]  ;;  %v930_v33 = vpack.c.bf16 %v173_v28, %v172_v27  ;;  %v192_v40 = vld [vmem:[#allocation6 + $0x4a0] sm:$0xff]  ;;  %v193_v41 = vld [vmem:[#allocation6 + $0x4a8] sm:$0xff] }
  0x54   :  { %907 = vmatpush3.bf16.msra.mxu1 %v906_v25  ;;  %v926_v25 = vpack.c.bf16 %v155_v19, %v154_v17  ;;  %v235_v34 = vrot.slane %v1097_v15, %v234_v24  ;;  %v176_v44 = vld [vmem:[#allocation6 + $0x420] sm:$0xff]  ;;  %v177_v45 = vld [vmem:[#allocation6 + $0x428] sm:$0xff]  ;;  %v194_v15 = vld [vmem:[#allocation6 + $0x4b0] sm:$0xff]  ;;  %p1016_p5 = por %p1015_p4, %p1014_p3 }
  0x55   :  { %909 = vmatprep.subr.bf16.mxu1 %v908_v30  ;;  %v191_v30 = vld [vmem:[#allocation6 + $0x498] sm:$0xff]  ;;  %v938_v47 = vpack.c.bf16 %v177_v45, %v176_v44  ;;  %v180_v54 = vld [vmem:[#allocation6 + $0x440] sm:$0xff]  ;;  %v198_v56 = vld [vmem:[#allocation6 + $0x4d0] sm:$0xff] }
  0x56   :  { %879 = vmatpush3.bf16.msra.mxu0 %v878_v36  ;;  %v932_v35 = vpack.c.bf16 %v191_v30, %v190_v29  ;;  %v174_v36 = vld [vmem:[#allocation6 + $0x410] sm:$0xff]  ;;  %v195_v46 = vld [vmem:[#allocation6 + $0x4b8] sm:$0xff]  ;;  %v184_v3 = vld [vmem:[#allocation6 + $0x460] sm:$0xff]  ;;  %p1017_p6 = pnand %p1016_p5, %p1010_p2 }
  0x57   :  { %881 = vmatprep.subr.bf16.mxu0 %v880_v38  ;;  %v247_v38 = vrot.slane %v1115_v31, %v214_v6  ;;  %v940_v48 = vpack.c.bf16 %v195_v46, %v194_v15  ;;  %v196_v6 = vld [vmem:[#allocation6 + $0x4c0] sm:$0xff]  ;;  %v199_v58 = vld [vmem:[#allocation6 + $0x4d8] sm:$0xff]  ;;  %v182_v61 = vld [vmem:[#allocation6 + $0x450] sm:$0xff] }
  0x58   :  { %911 = vmatpush3.bf16.msra.mxu1 %v910_v37  ;;  %v175_v37 = vld [vmem:[#allocation6 + $0x418] sm:$0xff]  ;;  %v948_v60 = vpack.c.bf16 %v199_v58, %v198_v56  ;;  %v202_v5 = vld [vmem:[#allocation6 + $0x4f0] sm:$0xff] }
  0x59   :  { %913 = vmatprep.subr.bf16.mxu1 %v912_v43  ;;  %v934_v42 = vpack.c.bf16 %v175_v37, %v174_v36  ;;  %v936_v43 = vpack.c.bf16 %v193_v41, %v192_v40  ;;  %v203_v7 = vld [vmem:[#allocation6 + $0x4f8] sm:$0xff]  ;;  %v186_v10 = vld [vmem:[#allocation6 + $0x470] sm:$0xff] }
  0x5a   :  { %883 = vmatpush3.bf16.msra.mxu0 %v882_v49  ;;  %v178_v49 = vld [vmem:[#allocation6 + $0x430] sm:$0xff]  ;;  %v956_v9 = vpack.c.bf16 %v203_v7, %v202_v5 }
  0x5b   :  { %885 = vmatprep.subr.bf16.mxu0 %v884_v51  ;;  %v197_v51 = vld [vmem:[#allocation6 + $0x4c8] sm:$0xff] }
  0x5c   :  { %915 = vmatpush3.bf16.msra.mxu1 %v914_v50  ;;  %v179_v50 = vld [vmem:[#allocation6 + $0x438] sm:$0xff]  ;;  %v944_v53 = vpack.c.bf16 %v197_v51, %v196_v6 }
  0x5d   :  { %917 = vmatprep.subr.bf16.mxu1 %v916_v55  ;;  %v942_v52 = vpack.c.bf16 %v179_v50, %v178_v49  ;;  %v181_v55 = vld [vmem:[#allocation6 + $0x448] sm:$0xff] }
  0x5e   :  { %887 = vmatpush3.bf16.msra.mxu0 %v886_v62  ;;  %v946_v59 = vpack.c.bf16 %v181_v55, %v180_v54  ;;  %v183_v62 = vld [vmem:[#allocation6 + $0x458] sm:$0xff] }
  0x5f   :  { %889 = vmatprep.subr.bf16.mxu0 %v888_v0  ;;  %v201_v0 = vld [vmem:[#allocation6 + $0x4e8] sm:$0xff]  ;;  %v950_v1 = vpack.c.bf16 %v183_v62, %v182_v61 }
  0x60   :  { %919 = vmatpush3.bf16.msra.mxu1 %v918_v63  ;;  %v200_v63 = vld [vmem:[#allocation6 + $0x4e0] sm:$0xff] }
  0x61   :  { %921 = vmatprep.subr.bf16.mxu1 %v920_v4  ;;  %v952_v2 = vpack.c.bf16 %v201_v0, %v200_v63  ;;  %v185_v4 = vld [vmem:[#allocation6 + $0x468] sm:$0xff] }
  0x62   :  { %891 = vmatpush3.bf16.msra.mxu0 %v890_v11  ;;  %v954_v8 = vpack.c.bf16 %v185_v4, %v184_v3  ;;  %v187_v11 = vld [vmem:[#allocation6 + $0x478] sm:$0xff] }
  0x63   :  { %893 = vmatprep.subr.bf16.mxu0 %v892_v13  ;;  %v243_v13 = vrot.slane %v1115_v31, %v210_v39 }
  0x64   :  { %923 = vmatpush3.bf16.msra.mxu1 %v922_v12  ;;  %v958_v12 = vpack.c.bf16 %v187_v11, %v186_v10 }
  0x65   :  { %925 = vmatprep.subr.bf16.mxu1 %v924_v18 }
  0x66   :  { %895 = vmatpush3.bf16.msra.mxu0 %v894_v23 }
  0x67   :  { %929 = vmatprep.subr.bf16.mxu0 %v928_v26 }
  0x68   :  { %927 = vmatpush3.bf16.msra.mxu1 %v926_v25 }
  0x69   :  { %463 = vmatmul.mubr.f32.vlgmr.msra.gmra.mrb[2].mxu0 %v227_v32 }
  0x6a   :  { %931 = vmatpush3.bf16.msra.mxu0 %v930_v33  ;;  %602 = vmatprep.mubr.f32.mxu0 %v247_v38 }
  0x6b   :  { %533 = vmatmul.mubr.f32.vlgmr.msra.gmra.mrb[2].mxu1 %v235_v34  ;;  %933 = vmatprep.subr.bf16.mxu0 %v932_v35 }
  0x6e   :  { %935 = vmatpush3.bf16.msra.mxu0 %v934_v42 }
  0x6f   :  { %937 = vmatprep.subr.bf16.mxu0 %v936_v43 }
  0x72   :  { %939 = vmatpush3.bf16.msra.mxu0 %v938_v47 }
  0x73   :  { %941 = vmatprep.subr.bf16.mxu0 %v940_v48 }
  0x76   :  { %943 = vmatpush3.bf16.msra.mxu0 %v942_v52 }
  0x77   :  { %945 = vmatprep.subr.bf16.mxu0 %v944_v53 }
  0x7a   :  { %947 = vmatpush3.bf16.msra.mxu0 %v946_v59 }
  0x7b   :  { %949 = vmatprep.subr.bf16.mxu0 %v948_v60 }
  0x7e   :  { %951 = vmatpush3.bf16.msra.mxu0 %v950_v1 }
  0x7f   :  { %953 = vmatprep.subr.bf16.mxu0 %v952_v2 }
  0x82   :  { %955 = vmatpush3.bf16.msra.mxu0 %v954_v8 }
  0x83   :  { %957 = vmatprep.subr.bf16.mxu0 %v956_v9 }
  0x86   :  { %959 = vmatpush3.bf16.msra.mxu0 %v958_v12 }
  0x89   :  { %603 = vmatmul.mubr.f32.vlgmr.msra.gmra.mrb[4].mxu0 %v243_v13 }
 0x11c   :  { %v657_v14 = vpop.f32.mrb[0].mxu0 }
 0x11d   :  { %v658_v17 = vpop.f32.mrb[1].mxu0 }
 0x11e   :  { %v692_v18 = vpop.f32.mrb[0].mxu1  ;;  %v659_v19 = vadd.f32 %v658_v17, %v657_v14 }
 0x11f   :  { %v693_v20 = vpop.f32.mrb[1].mxu1 }
 0x120   :  { %v694_v21 = vadd.f32 %v693_v20, %v692_v18  ;;  %v325_v22 = vadd.f32 %v659_v19, %v205_v16 }
 0x122   :  { %v395_v23 = vadd.f32 %v694_v21, %v325_v22 }
 0x13c   :  { %v727_v24 = vpop.f32.mrb[2].mxu0 }
 0x13d   :  { %v728_v25 = vpop.f32.mrb[3].mxu0 }
 0x13e   :  { %v762_v26 = vpop.f32.mrb[2].mxu1  ;;  %v729_v57 = vadd.f32 %v728_v25, %v727_v24 }
 0x13f   :  { %v763_v27 = vpop.f32.mrb[3].mxu1 }
 0x140   :  { %v764_v39 = vadd.f32 %v763_v27, %v762_v26  ;;  %v465_v28 = vadd.f32 %v729_v57, %v395_v23 }
 0x142   :  { %v535_v29 = vadd.f32 %v764_v39, %v465_v28 }
 0x15c   :  { %v797_v30 = vpop.f32.mrb[4].mxu0 }
 0x15d   :  { %v798_v31 = vpop.f32.mrb[5].mxu0 }
 0x15e   :  { %v799_v32 = vadd.f32 %v798_v31, %v797_v30 }
 0x160   :  { %v605_v33 = vadd.f32 %v799_v32, %v535_v29 }
 0x162   :  { %608 = vst [vmem:[#allocation8] sm:$0x1] %v605_v33 }
 0x163   :  { %1020 = shalt.err (!%p1017_p6)
}
 0x164   :  { %s1021_s16 = scalar_lea.hbm %s1143_s3, 16 }
 0x165   :  { %p1022_p7 = scmp.ne.s32.totalorder %s1143_s3, %s1021_s16  ;;  %p1025_p8 = scmp.lt.u32.totalorder %s1021_s16, %s1143_s3 }
 0x167   :  { %p1027_p9 = pnand %p1025_p8, %p1022_p7 }
 0x169   :  { %1030 = shalt.err (!%p1027_p9)
}
 0x16a   :  { %618 = dma.vmem_to_hbm [thread:$0]  %s616_s12, 16, %s1143_s3, [#allocation5]  }
 0x16b   :  { %1035 = dma.done.wait [#allocation5], 16  }
 0x16c   :  { %1036 = vsyncadd [#allocation5], 4294967280 }
 0x16d   :  { %622 = vsyncpa [#allocation4], 1 }
 0x16e   :  { %623 = vsyncpa [#allocation7], 1 }
 0x16f   :  { %624 = vsyncpa [#allocation5], 1 }

</bundles_post_ra>
